<compile_context>
chip_gen: v6e
topology: v6e:2x2x1
jax: 0.10.0
libtpu: 0.0.40
codegen_flags: <defaults>
</compile_context>

<pallas_src>
import jax
import jax.numpy as jnp
import numpy as np
from jax import lax
from jax.experimental import pallas as pl
from jax.experimental.pallas import tpu as pltpu

# Explicit scoped-VMEM limit: above the 16/32 MiB scoped defaults, below v7x's
# 64 MiB physical per-TensorCore VMEM.
_VMEM_LIMIT = 48 * 1024 * 1024


# ---------------------------------------------------------------------------
# Stage 1: batch-independent user/group aggregation (cacheable)
# ---------------------------------------------------------------------------
def aggregate_group_embeds(ui, gu, item_emb, *, user_tile=128, item_tile=512):
    """group_embeds (G, D) f32 from dense interaction matrices + item table.

    ui is assumed 0/1-valued (interaction matrix), so sum(ui) == sum(ui > 0)
    and the per-user positive-item count is produced by the same MXU matmul via
    a ones column appended to the item table.  ui / gu are passed as stored and
    cast to bf16 per tile inside the kernels.
    """
    U, I = ui.shape
    G = gu.shape[0]
    D = item_emb.shape[1]
    De = D + 1

    # Tiny and cacheable: item table + ones column (row counts for free).
    item_ext = jnp.concatenate(
        [item_emb.astype(jnp.bfloat16), jnp.ones((I, 1), jnp.bfloat16)], axis=1)

    # Biggest aligned tile that divides the dim, else fall back to the full dim
    # (full-dim blocks always satisfy the (8,128) rule).
    TU = user_tile if (U % user_tile == 0 and user_tile % 8 == 0) else U
    TI = item_tile if (I % item_tile == 0 and item_tile % 128 == 0) else I

    def user_kernel(ui_ref, item_ref, uext_ref, acc_ref):
        @pl.when(pl.program_id(1) == 0)
        def _init():
            acc_ref[...] = jnp.zeros_like(acc_ref)

        acc_ref[...] += jnp.dot(ui_ref[...].astype(jnp.bfloat16), item_ref[...],
                                preferred_element_type=jnp.float32)

        @pl.when(pl.program_id(1) == pl.num_programs(1) - 1)
        def _finalize():
            acc = acc_ref[...]
            counts = jnp.maximum(acc[:, D:], 1.0)        # sums[sums < 1] = 1
            uext_ref[:, :D] = acc[:, :D] / counts        # user embeds
            uext_ref[:, D:] = jnp.ones_like(counts)      # ones col -> group counts

    user_ext = pl.pallas_call(
        user_kernel,
        grid=(U // TU, I // TI),
        in_specs=[pl.BlockSpec((TU, TI), lambda u, i: (u, i)),
                  pl.BlockSpec((TI, De), lambda u, i: (i, 0))],
        out_specs=pl.BlockSpec((TU, De), lambda u, i: (u, 0)),
        out_shape=jax.ShapeDtypeStruct((U, De), jnp.float32),
        scratch_shapes=[pltpu.VMEM((TU, De), jnp.float32)],
        compiler_params=pltpu.CompilerParams(
            dimension_semantics=("parallel", "arbitrary"),
            vmem_limit_bytes=_VMEM_LIMIT),
    )(ui, item_ext)

    TUg = 128 if U % 128 == 0 else U

    def group_kernel(gu_ref, uext_ref, gemb_ref, acc_ref):
        @pl.when(pl.program_id(0) == 0)
        def _init():
            acc_ref[...] = jnp.zeros_like(acc_ref)

        acc_ref[...] += jnp.dot(gu_ref[...].astype(jnp.bfloat16),
                                uext_ref[...].astype(jnp.bfloat16),
                                preferred_element_type=jnp.float32)

        @pl.when(pl.program_id(0) == pl.num_programs(0) - 1)
        def _finalize():
            acc = acc_ref[...]
            # no clamp — matches torch (an empty group yields inf/nan there too)
            gemb_ref[...] = acc[:, :D] / acc[:, D:]

    group_emb = pl.pallas_call(
        group_kernel,
        grid=(U // TUg,),
        in_specs=[pl.BlockSpec((G, TUg), lambda u: (0, u)),
                  pl.BlockSpec((TUg, De), lambda u: (u, 0))],
        out_specs=pl.BlockSpec((G, D), lambda u: (0, 0)),
        out_shape=jax.ShapeDtypeStruct((G, D), jnp.float32),
        scratch_shapes=[pltpu.VMEM((G, De), jnp.float32)],
        compiler_params=pltpu.CompilerParams(
            dimension_semantics=("arbitrary",),
            vmem_limit_bytes=_VMEM_LIMIT),
    )(gu, user_ext)
    # TODO(synk): also tile the G axis (grid (G//TG, U//TUg)) once num_groups is large.
    return group_emb


# ---------------------------------------------------------------------------
# Stage 2: per-batch gather (one-hot MXU) + PredictLayer MLP + sigmoid
# ---------------------------------------------------------------------------
def gather_predict(group_emb, item_emb, group_inputs, item_inputs,
                   w1g, w1i, b1, w2, b2, *, batch_tile=128):
    """sigmoid(PredictLayer(cat(group_emb[g], item_emb[i], dim=1))) -> (B, 1)."""
    B = group_inputs.shape[0]
    G, D = group_emb.shape
    I = item_emb.shape[0]
    H = w1g.shape[1]
    TB = batch_tile if (B % batch_tile == 0 and batch_tile % 128 == 0) else B

    # Transposed bf16 operands: the batch lives in the lane dimension so the
    # gather one-hots, the MLP activations and the output row are lane-dense.
    # These are tiny (tables / weights) and cacheable alongside group_emb.
    gembT = group_emb.T.astype(jnp.bfloat16)            # (D, G)
    iembT = item_emb.T.astype(jnp.bfloat16)             # (D, I)
    w1gT = w1g.T.astype(jnp.bfloat16)                   # (H, D)  = W1[:D].T
    w1iT = w1i.T.astype(jnp.bfloat16)                   # (H, D)  = W1[D:].T
    b1c = jnp.reshape(b1, (H, 1)).astype(jnp.float32)   # (H, 1)
    w2c = jnp.reshape(w2, (H, 1)).astype(jnp.float32)   # (H, 1)
    b2s = jnp.reshape(b2, (1, 1)).astype(jnp.float32)   # scalar, via SMEM
    gi = group_inputs.astype(jnp.int32).reshape(1, B)
    ii = item_inputs.astype(jnp.int32).reshape(1, B)

    def predict_kernel(gi_ref, ii_ref, gembT_ref, iembT_ref, w1gT_ref, w1iT_ref,
                       b1_ref, w2_ref, b2_ref, out_ref):
        # Row gather as a one-hot bf16 MXU matmul (indices stay lane-resident).
        # Out-of-range indices select nothing instead of faulting — torch would
        # raise; bounds remain the caller's responsibility.
        num_g = gembT_ref.shape[1]
        num_i = iembT_ref.shape[1]
        oh_g = (lax.broadcasted_iota(jnp.int32, (num_g, TB), 0)
                == gi_ref[...]).astype(jnp.bfloat16)                  # (G, TB)
        oh_i = (lax.broadcasted_iota(jnp.int32, (num_i, TB), 0)
                == ii_ref[...]).astype(jnp.bfloat16)                  # (I, TB)
        g_cols = jnp.dot(gembT_ref[...], oh_g,
                         preferred_element_type=jnp.float32)          # (D, TB)
        i_cols = jnp.dot(iembT_ref[...], oh_i,
                         preferred_element_type=jnp.float32)          # (D, TB)

        # PredictLayer (transposed): Linear(2D,H) -> ReLU -> Dropout(p=0)
        #   cat([g, i], 1) @ W1  ==  W1[:D].T @ g_cols + W1[D:].T @ i_cols
        h = (jnp.dot(w1gT_ref[...], g_cols.astype(jnp.bfloat16),
                     preferred_element_type=jnp.float32)
             + jnp.dot(w1iT_ref[...], i_cols.astype(jnp.bfloat16),
                       preferred_element_type=jnp.float32)
             + b1_ref[...])                                           # (H, TB)
        h = jnp.maximum(h, 0.0)
        # Final Linear(H, 1) as a VPU multiply + sublane reduce (an N=1 MXU
        # matmul would waste the array); result is a lane-dense (1, TB) row.
        logits = jnp.sum(h * w2_ref[...], axis=0, keepdims=True) + b2_ref[0, 0]
        out_ref[...] = jax.nn.sigmoid(logits)

    def _invariant(shape):
        # Grid-invariant operand, whole array resident in VMEM.
        # TODO(synk): single-buffer these (pipeline_mode=pl.Buffered(1)) and, at
        # large I, keep the item table in HBM (memory_space=pl.ANY) and
        # DMA-gather only the TB needed rows per step (double-buffered).
        return pl.BlockSpec(shape, lambda b: (0, 0))

    out = pl.pallas_call(
        predict_kernel,
        grid=(B // TB,),
        in_specs=[
            pl.BlockSpec((1, TB), lambda b: (0, b)),   # group indices (lane-resident)
            pl.BlockSpec((1, TB), lambda b: (0, b)),   # item indices
            _invariant((D, G)),
            _invariant((D, I)),
            _invariant((H, D)),
            _invariant((H, D)),
            _invariant((H, 1)),
            _invariant((H, 1)),
            pl.BlockSpec(memory_space=pltpu.MemorySpace.SMEM),   # b2 scalar
        ],
        out_specs=pl.BlockSpec((1, TB), lambda b: (0, b)),       # lane-dense row
        out_shape=jax.ShapeDtypeStruct((1, B), jnp.float32),
        compiler_params=pltpu.CompilerParams(
            dimension_semantics=("parallel",),   # B//TB >= 2 shards over v7x TCs
            vmem_limit_bytes=_VMEM_LIMIT),
    )(gi, ii, gembT, iembT, w1gT, w1iT, b1c, w2c, b2s)
    return out.reshape(B, 1)


def greca_forward(ui, gu, item_emb, group_inputs, item_inputs,
                  w1g, w1i, b1, w2, b2, *, drop_ratio=0.0):
    # TODO(synk): training-mode Dropout (drop_ratio > 0) not implemented.
    assert drop_ratio == 0.0, "only inference (drop_ratio == 0) is implemented"
    # Stage 1 is independent of (group_inputs, item_inputs): hoist/cache it when
    # the interaction matrices are fixed across batches.
    group_emb = aggregate_group_embeds(ui, gu, item_emb)
    # Stage 2: per-batch hot path (one-hot gather + MLP only).
    return gather_predict(group_emb, item_emb, group_inputs, item_inputs,
                          w1g, w1i, b1, w2, b2)


# ---------------------------------------------------------------------------
# Pure-JAX reference (f32, exact division, index gather) for validation
# ---------------------------------------------------------------------------
def greca_reference(ui, gu, item_emb, group_inputs, item_inputs,
                    w1g, w1i, b1, w2, b2):
    counts = jnp.maximum(jnp.sum((ui > 0).astype(jnp.float32), axis=1, keepdims=True), 1.0)
    user_emb = (ui @ item_emb) / counts
    group_emb = (gu @ user_emb) / jnp.sum(gu, axis=1, keepdims=True)
    g = group_emb[group_inputs]
    i = item_emb[item_inputs]
    h = jnp.maximum(g @ w1g + i @ w1i + b1, 0.0)
    return jax.nn.sigmoid(h @ w2 + b2)


if __name__ == "__main__":
    # Shapes chosen small but large enough to exercise the tiled grids:
    # embedding_dim=16 -> PredictLayer layers=[2*16, 8]; batch tile = 128.
    D = 16            # embedding_dim
    H = 8             # hidden layer of PredictLayer
    I = 256           # num_items
    U = 256           # num_users
    G = 8             # num_groups
    B = 256           # batch (2 grid steps at TB=128)

    key = jax.random.PRNGKey(0)
    k_ui, k_gu, k_emb, k_w1, k_w2, k_gi, k_ii = jax.random.split(key, 7)

    # Dense binary interaction matrices (stand-in for sparse .todense()).
    ui = (jax.random.uniform(k_ui, (U, I)) < 0.4).astype(jnp.float32)
    gu = (jax.random.uniform(k_gu, (G, U)) < 0.5).astype(jnp.float32)
    gu = gu.at[:, 0].set(1.0)   # avoid empty groups (torch divides by zero there too)

    # Deterministic parameter init (synthetic, not a checkpoint load).
    item_emb = 0.1 * jax.random.normal(k_emb, (I, D), dtype=jnp.float32)
    w1 = 0.1 * jax.random.normal(k_w1, (2 * D, H), dtype=jnp.float32)  # Linear(2D,H), (in,out)
    w1g, w1i = w1[:D], w1[D:]
    b1 = 0.01 * jnp.ones((1, H), dtype=jnp.float32)
    w2 = 0.1 * jax.random.normal(k_w2, (H, 1), dtype=jnp.float32)      # Linear(H, 1)
    b2 = jnp.zeros((1, 1), dtype=jnp.float32)

    group_inputs = jax.random.randint(k_gi, (B,), 0, G, dtype=jnp.int32)
    item_inputs = jax.random.randint(k_ii, (B,), 0, I, dtype=jnp.int32)

    y = greca_forward(ui, gu, item_emb, group_inputs, item_inputs,
                      w1g, w1i, b1, w2, b2)
    y = jax.block_until_ready(y)

    y_ref = greca_reference(ui, gu, item_emb, group_inputs, item_inputs,
                            w1g, w1i, b1, w2, b2)
    assert y.shape == (B, 1)
    # Tolerance accounts for bf16 matmul operands inside the kernels.
    assert np.allclose(np.asarray(y), np.asarray(y_ref), atol=5e-3), "mismatch vs reference"
    print("KERNEL_OK")
</pallas_src>

<mosaic_0001>
module attributes {stable_mosaic.version = 11 : i64} {
  func.func @user_kernel(%arg0: i32, %arg1: i32, %arg2: memref<128x256xf32, #tpu.memory_space<vmem>>, %arg3: memref<256x17xbf16, #tpu.memory_space<vmem>>, %arg4: memref<128x17xf32, #tpu.memory_space<vmem>>, %arg5: memref<128x17xf32, #tpu.memory_space<vmem>>) attributes {dimension_semantics = [#tpu.dimension_semantics<parallel>, #tpu.dimension_semantics<arbitrary>], iteration_bounds = array<i64: 2, 1>, scalar_prefetch = 0 : i64, scratch_operands = 1 : i64, tpu.core_type = #tpu.core_type<tc>, window_params = [{transform_indices = @transform_0, window_bounds = array<i64: 128, 256>}, {transform_indices = @transform_1, window_bounds = array<i64: 256, 17>}, {transform_indices = @transform_2, window_bounds = array<i64: 128, 17>}]} {
    %c0_i32 = arith.constant 0 : i32
    %0 = arith.cmpi eq, %arg1, %c0_i32 : i32
    %1 = arith.extui %0 : i1 to i32
    %c0_i32_0 = arith.constant 0 : i32
    %2 = arith.cmpi ne, %1, %c0_i32_0 : i32
    scf.if %2 {
      %cst_10 = arith.constant 0.000000e+00 : f32
      %13 = vector.broadcast %cst_10 : f32 to vector<128x17xf32>
      %c0_11 = arith.constant 0 : index
      %c0_12 = arith.constant 0 : index
      %14 = vector.load %arg5[%c0_11, %c0_12] : memref<128x17xf32, #tpu.memory_space<vmem>>, vector<128x17xf32>
      tpu.vector_store %arg5[%c0_11, %c0_12], %13 {strides = array<i32>} : memref<128x17xf32, #tpu.memory_space<vmem>>, vector<128x17xf32>,
    } else {
    }
    %c0 = arith.constant 0 : index
    %c0_1 = arith.constant 0 : index
    %3 = vector.load %arg5[%c0, %c0_1] : memref<128x17xf32, #tpu.memory_space<vmem>>, vector<128x17xf32>
    %c0_2 = arith.constant 0 : index
    %c0_3 = arith.constant 0 : index
    %4 = vector.load %arg2[%c0_2, %c0_3] : memref<128x256xf32, #tpu.memory_space<vmem>>, vector<128x256xf32>
    %5 = arith.truncf %4 : vector<128x256xf32> to vector<128x256xbf16>
    %c0_4 = arith.constant 0 : index
    %c0_5 = arith.constant 0 : index
    %6 = vector.load %arg3[%c0_4, %c0_5] : memref<256x17xbf16, #tpu.memory_space<vmem>>, vector<256x17xbf16>
    %cst = arith.constant dense<0.000000e+00> : vector<128x17xf32>
    %7 = tpu.matmul %5, %6, %cst {dimension_numbers = #tpu.dot_dimension_numbers<[1], [0], [0], [1], [0, 0, 1, 1], [], []>} : vector<128x256xbf16>, vector<256x17xbf16>, vector<128x17xf32> -> vector<128x17xf32>
    %8 = arith.addf %3, %7 : vector<128x17xf32>
    %c0_6 = arith.constant 0 : index
    %c0_7 = arith.constant 0 : index
    %9 = vector.load %arg5[%c0_6, %c0_7] : memref<128x17xf32, #tpu.memory_space<vmem>>, vector<128x17xf32>
    tpu.vector_store %arg5[%c0_6, %c0_7], %8 {strides = array<i32>} : memref<128x17xf32, #tpu.memory_space<vmem>>, vector<128x17xf32>,
    %c0_i32_8 = arith.constant 0 : i32
    %10 = arith.cmpi eq, %arg1, %c0_i32_8 : i32
    %11 = arith.extui %10 : i1 to i32
    %c0_i32_9 = arith.constant 0 : i32
    %12 = arith.cmpi ne, %11, %c0_i32_9 : i32
    scf.if %12 {
      %c0_10 = arith.constant 0 : index
      %c0_11 = arith.constant 0 : index
      %13 = vector.load %arg5[%c0_10, %c0_11] : memref<128x17xf32, #tpu.memory_space<vmem>>, vector<128x17xf32>
      %14 = vector.extract_strided_slice %13 {offsets = [0, 16], sizes = [128, 1], strides = [1, 1]} : vector<128x17xf32> to vector<128x1xf32>
      %cst_12 = arith.constant 1.000000e+00 : f32
      %15 = vector.broadcast %cst_12 : f32 to vector<128x1xf32>
      %16 = arith.maximumf %14, %15 : vector<128x1xf32>
      %17 = vector.extract_strided_slice %13 {offsets = [0, 0], sizes = [128, 16], strides = [1, 1]} : vector<128x17xf32> to vector<128x16xf32>
      %18 = vector.broadcast %16 : vector<128x1xf32> to vector<128x16xf32>
      %19 = arith.divf %17, %18 : vector<128x16xf32>
      %c0_13 = arith.constant 0 : index
      %c0_14 = arith.constant 0 : index
      %20 = vector.load %arg4[%c0_13, %c0_14] : memref<128x17xf32, #tpu.memory_space<vmem>>, vector<128x16xf32>
      tpu.vector_store %arg4[%c0_13, %c0_14], %19 {strides = array<i32>} : memref<128x17xf32, #tpu.memory_space<vmem>>, vector<128x16xf32>,
      %cst_15 = arith.constant 1.000000e+00 : f32
      %21 = vector.broadcast %cst_15 : f32 to vector<128x1xf32>
      %c0_16 = arith.constant 0 : index
      %c16 = arith.constant 16 : index
      %22 = vector.load %arg4[%c0_16, %c16] : memref<128x17xf32, #tpu.memory_space<vmem>>, vector<128x1xf32>
      tpu.vector_store %arg4[%c0_16, %c16], %21 {strides = array<i32>} : memref<128x17xf32, #tpu.memory_space<vmem>>, vector<128x1xf32>,
    } else {
    }
    return
  }
  func.func @transform_0(%arg0: i32, %arg1: i32) -> (i32, i32) {
    %c0_i32 = arith.constant 0 : i32
    return %arg0, %arg1 : i32, i32
  }
  func.func @transform_1(%arg0: i32, %arg1: i32) -> (i32, i32) {
    %c0_i32 = arith.constant 0 : i32
    %c0_i32_0 = arith.constant 0 : i32
    return %arg1, %c0_i32 : i32, i32
  }
  func.func @transform_2(%arg0: i32, %arg1: i32) -> (i32, i32) {
    %c0_i32 = arith.constant 0 : i32
    %c0_i32_0 = arith.constant 0 : i32
    return %arg0, %c0_i32 : i32, i32
  }
}

</mosaic_0001>

<bundles_post_ra>
// kernel: tpu_custom_call.1
= control target key start
LH: loop header
LB: loop body
LE: loop exit
PB: predicated region body
PF: predicated region fallthrough
CT: control target
= control target key end

     0   :  { %7 = vsyncpa [#allocation4], 0  ;;  %s1504_s0 = inlined_call_operand.hbm [shape: f32[256,256], index: 0, kind: input, shape index: {}]   ;;  %s1505_s1 = inlined_call_operand.vmem [shape: bf16[256,17], index: 1, kind: input, shape index: {}]   ;;  %s1506_s2 = inlined_call_operand.vmem [shape: f32[256,17], index: 2, kind: output, shape index: {}]  }
   0x1   :  { %9 = vsyncpa [#allocation4 + $0x1], 0  ;;  %s1149_s9 = smov 0   ;;  %s1151_s10 = smov 0  }
   0x2   :  { %s1153_s11 = smov 0   ;;  %s1155_s12 = smov 0  }
   0x3   :  { %s1157_s13 = smov 0   ;;  %s1159_s14 = smov 0  }
   0x4 LB: > { %s825_s15 = sadd.s32 4294967295, %s1126_s14   ;;  %s27_s16 = sadd.s32 1, %s1122_s13  ;;  %s1126_s14 = sphi %s1159_s14, %s15_s14   ;;  %s1122_s13 = sphi %s1157_s13, %s1514_s13   ;;  %s1118_s12 = sphi %s1155_s12, %s1513_s12   ;;  %s1114_s11 = sphi %s1153_s11, %s1512_s11   ;;  %s1110_s10 = sphi %s1151_s10, %s1511_s10   ;;  %s1106_s9 = sphi %s1149_s9, %s1510_s9  }
   0x5   : > { %p29_p0 = scmp.ge.s32.totalorder %s27_s16, 2  ;;  %s36_s17 = sadd.s32 1, %s1114_s11 }
   0x6   : > { %p43_p1 = scmp.ne.s32.totalorder %s1114_s11, %s1110_s10  ;;  %p44_p2 = scmp.eq.s32.totalorder %s1126_s14, 0 }
   0x7   : > { %s1516_s16 = smov (%p29_p0, %s27_s16), 0  ;;  %p49_p4 = scmp.ne.s32.totalorder %s1110_s10, %s1106_s9 }
   0x8   : > { %p1185_p3 = por %p44_p2, %p43_p1  ;;  %s31_s19 = ssub.s32 %s1122_s13, %s1516_s16 }
   0x9   : > { %p50_p5 = scmp.eq.s32.totalorder %s825_s15, 0  ;;  %p34_p6 = scmp.eq.s32.totalorder %s31_s19, 0 }
   0xa   : > { %p944_p8 = scmp.lt.s32.totalorder %s1126_s14, 2  ;;  %s134_s22 = sand.u32 1, %s1114_s11  }
   0xb   : > { %p1192_p7 = por %p50_p5, %p49_p4  ;;  %s857_s23 = sshll.u32 %s1122_s13, 12 }
   0xc   : > { %s1198_s21 = scalar_select %p34_p6, %s1114_s11, %s36_s17  }
   0xd   : > { %s830_s24 = sshll.u32 %s134_s22, 8  ;;  %s147_s27 = scalar_lea.hbm %s1504_s0, %s857_s23 }
   0xe   : > { %s138_s28 = scalar_lea.vmem [#allocation3], %s830_s24  ;;  %p1207_p9 = pnand %p944_p8, %p1185_p3 }
   0xf   : > { %s148_s29 = sshll.u32 %s138_s28, 4  ;;  %s135_s3 = scalar_lea.sflag [#allocation4], %s134_s22  ;;  %s149_s29 = int_to_ptr.vmem [resolvable:$true] %s148_s29 }
  0x10   : > { %p1050_p10 = pneg %p1207_p9  ;;  %s1061_s4 = scalar_lea.vmem %s149_s29, 4096 }
  0x11   : > { %p1062_p11 = scmp.ne.s32.totalorder %s149_s29, %s1061_s4  ;;  %s1128_s5 = smov [#allocation3]  }
  0x12   : > { %s1066_s6 = sshll.u32 %s1128_s5, 4  ;;  %s1067_s6 = int_to_ptr.vmem [resolvable:$false] %s1066_s6 }
  0x13   : > { %p1064_p12 = pnand %p1062_p11, %p1050_p10  ;;  %s1068_s7 = scalar_lea.vmem %s1067_s6, 8192 }
  0x14   : > { %p1069_p0 = scmp.lt.s32.totalorder %s149_s29, %s1067_s6  ;;  %p1070_p1 = scmp.lt.s32.totalorder %s1068_s7, %s1061_s4 }
  0x15   : > { %p1065_p13 = pneg %p1064_p12 }
  0x16   : > { %p1071_p2 = por %p1070_p1, %p1069_p0 }
  0x18   : > { %p1072_p3 = pnand %p1071_p2, %p1065_p13 }
  0x1a   : > { %1075 = shalt.err (!%p1072_p3)
}
  0x1b   : > { %s1129_s8 = smov 256   ;;  %s1130_s9 = smov 16  }
  0x1c   : > { %943 = dma.hbm_to_vmem [thread:$0]  (!%p1207_p9), %s147_s27, 4096, %s149_s29, %s135_s3, %s1129_s8, %s1129_s8, %s1130_s9  }
  0x1d   : > { %p834_p4 = scmp.ge.s32.totalorder %s1126_s14, 1  ;;  %p156_p5 = scmp.lt.s32.totalorder %s1126_s14, 3 }
  0x1f   : > { %p157_p6 = pnand %p834_p4, %p156_p5 }
  0x20   : > { %s162_s15 = sand.u32 (!%p157_p6), 1, %s1110_s10  }
  0x21   : > { %160 = sbr.rel (%p157_p6) target bundleno = 455 (0x1c7), region = 28  ;;  %s835_s17 = sshll.u32 (!%p157_p6), %s162_s15, 8 }
  0x22   : > { %s163_s18 = scalar_lea.sflag (!%p157_p6), [#allocation4], %s162_s15  ;;  %s1218_s19 = scalar_lea.vmem (!%p157_p6), [#allocation3], %s835_s17 }
  0x26   : > { %1101 = dma.done.wait (%p1192_p7), %s163_s18, 4096  }
  0x27   : > { %1103 = vsyncadd (%p1192_p7), %s163_s18, 4294963200  ;;  %v1000_v0 = vld [vmem:[%s1505_s1 + $0x78] sm:$0xff]   ;;  %v1002_v2 = vld [vmem:[%s1505_s1 + $0x70] sm:$0xff]   ;;  %vm211_vm0 = vcmask 138240   ;;  %vm697_vm1 = vcmask 130048   ;;  %vm714_vm2 = vcmask 138368  }
  0x28   : > { %v1001_v1 = vld [vmem:[%s1505_s1 + $0x38] sm:$0xff]   ;;  %858 = vmatprep.subr.bf16.mxu0 %v1000_v0  ;;  %922 = vmatprep.subr.bf16.mxu1 %v1000_v0  ;;  %v1003_v3 = vld [vmem:[%s1505_s1 + $0x30] sm:$0xff]   ;;  %v1004_v4 = vld [vmem:[%s1505_s1 + $0x68] sm:$0xff]   ;;  %v1131_v0 = vmov 0.0  }
  0x29   : > { %859 = vmatpush3.bf16.msra.mxu0 %v1001_v1  ;;  %930 = vmatpush3.bf16.msra.mxu1 %v1001_v1  ;;  %v1005_v5 = vld [vmem:[%s1505_s1 + $0x28] sm:$0xff]   ;;  %v1006_v6 = vld [vmem:[%s1505_s1 + $0x60] sm:$0xff]   ;;  %v1008_v8 = vld [vmem:[%s1505_s1 + $0x58] sm:$0xff]   ;;  %212 = vst.msk [vmem:[#allocation2] sm:$0xff] %vm211_vm0, %v1131_v0  ;;  %v1132_v1 = vmov 16  }
  0x2a   : > { %860 = vmatprep.subr.bf16.mxu0 %v1002_v2  ;;  %923 = vmatprep.subr.bf16.mxu1 %v1002_v2  ;;  %v1007_v7 = vld [vmem:[%s1505_s1 + $0x20] sm:$0xff]   ;;  %v1009_v9 = vld [vmem:[%s1505_s1 + $0x18] sm:$0xff]   ;;  %v1010_v10 = vld [vmem:[%s1505_s1 + $0x50] sm:$0xff]   ;;  %213 = vst.msk [vmem:[#allocation2 + $0x8] sm:$0xff] %vm211_vm0, %v1131_v0 }
  0x2b   : > { %v245_v11 = vld [vmem:[%s1218_s19 + $0x8] sm:$0xff]  ;;  %v247_v12 = vld [vmem:[%s1218_s19 + $0x18] sm:$0xff]  ;;  %v1011_v17 = vld [vmem:[%s1505_s1 + $0x10] sm:$0xff]   ;;  %214 = vst.msk [vmem:[#allocation2 + $0x10] sm:$0xff] %vm211_vm0, %v1131_v0  ;;  %998 = vset.pattern.permute.xlu0 %v1132_v1  ;;  %999 = vset.pattern.permute.xlu1 %v1132_v1 }
  0x2c   : > { %v261_v13 = vld [vmem:[%s1218_s19 + $0x88] sm:$0xff]  ;;  %v277_v14 = vpack.c.bf16 %v247_v12, %v245_v11  ;;  %v263_v15 = vld [vmem:[%s1218_s19 + $0x98] sm:$0xff]  ;;  %v1014_v20 = vld [vmem:[%s1505_s1 + $0x40] sm:$0xff]   ;;  %215 = vst.msk [vmem:[#allocation2 + $0x18] sm:$0xff] %vm211_vm0, %v1131_v0 }
  0x2d   : > { %861 = vmatpush3.bf16.msra.mxu0 %v1003_v3  ;;  %931 = vmatpush3.bf16.msra.mxu1 %v1003_v3  ;;  %v285_v16 = vpack.c.bf16 %v263_v15, %v261_v13  ;;  %v1012_v18 = vld [vmem:[%s1505_s1 + $0x48] sm:$0xff]   ;;  %v1015_v21 = vld [vmem:[%s1505_s1] sm:$0xff]   ;;  %v246_v23 = vld [vmem:[%s1218_s19 + $0x10] sm:$0xff]  ;;  %216 = vst.msk [vmem:[#allocation2 + $0x20] sm:$0xff] %vm211_vm0, %v1131_v0 }
  0x2e   : > { %862 = vmatprep.subr.bf16.mxu0 %v1004_v4  ;;  %924 = vmatprep.subr.bf16.mxu1 %v1004_v4  ;;  %v1013_v19 = vld [vmem:[%s1505_s1 + $0x8] sm:$0xff]   ;;  %v244_v22 = vld [vmem:[%s1218_s19] sm:$0xff]  ;;  %v262_v25 = vld [vmem:[%s1218_s19 + $0x90] sm:$0xff]  ;;  %217 = vst.msk [vmem:[#allocation2 + $0x28] sm:$0xff] %vm211_vm0, %v1131_v0 }
  0x2f   : > { %452 = vmatprep.mubr.bf16.mxu0 %v277_v14  ;;  %484 = vmatprep.mubr.bf16.mxu1 %v285_v16  ;;  %v260_v24 = vld [vmem:[%s1218_s19 + $0x80] sm:$0xff]  ;;  %v249_v26 = vld [vmem:[%s1218_s19 + $0x28] sm:$0xff]  ;;  %v251_v27 = vld [vmem:[%s1218_s19 + $0x38] sm:$0xff]  ;;  %v276_v30 = vpack.c.bf16 %v246_v23, %v244_v22  ;;  %218 = vst.msk [vmem:[#allocation2 + $0x30] sm:$0xff] %vm211_vm0, %v1131_v0 }
  0x30   : > { %v265_v28 = vld [vmem:[%s1218_s19 + $0xa8] sm:$0xff]  ;;  %v267_v29 = vld [vmem:[%s1218_s19 + $0xb8] sm:$0xff]  ;;  %v284_v31 = vpack.c.bf16 %v262_v25, %v260_v24  ;;  %v279_v32 = vpack.c.bf16 %v251_v27, %v249_v26  ;;  %v248_v34 = vld [vmem:[%s1218_s19 + $0x20] sm:$0xff]  ;;  %219 = vst.msk [vmem:[#allocation2 + $0x38] sm:$0xff] %vm211_vm0, %v1131_v0 }
  0x31   : > { %863 = vmatpush3.bf16.msra.mxu0 %v1005_v5  ;;  %932 = vmatpush3.bf16.msra.mxu1 %v1005_v5  ;;  %v287_v33 = vpack.c.bf16 %v267_v29, %v265_v28  ;;  %v250_v35 = vld [vmem:[%s1218_s19 + $0x30] sm:$0xff]  ;;  %v264_v36 = vld [vmem:[%s1218_s19 + $0xa0] sm:$0xff]  ;;  %v253_v38 = vld [vmem:[%s1218_s19 + $0x48] sm:$0xff]  ;;  %220 = vst.msk [vmem:[#allocation2 + $0x40] sm:$0xff] %vm211_vm0, %v1131_v0 }
  0x32   : > { %864 = vmatprep.subr.bf16.mxu0 %v1006_v6  ;;  %925 = vmatprep.subr.bf16.mxu1 %v1006_v6  ;;  %v266_v37 = vld [vmem:[%s1218_s19 + $0xb0] sm:$0xff]  ;;  %v255_v39 = vld [vmem:[%s1218_s19 + $0x58] sm:$0xff]  ;;  %v269_v40 = vld [vmem:[%s1218_s19 + $0xc8] sm:$0xff]  ;;  %v278_v42 = vpack.c.bf16 %v250_v35, %v248_v34  ;;  %221 = vst.msk [vmem:[#allocation2 + $0x48] sm:$0xff] %vm211_vm0, %v1131_v0 }
  0x33   : > { %v271_v41 = vld [vmem:[%s1218_s19 + $0xd8] sm:$0xff]  ;;  %v286_v43 = vpack.c.bf16 %v266_v37, %v264_v36  ;;  %v281_v44 = vpack.c.bf16 %v255_v39, %v253_v38  ;;  %v252_v46 = vld [vmem:[%s1218_s19 + $0x40] sm:$0xff]  ;;  %v254_v47 = vld [vmem:[%s1218_s19 + $0x50] sm:$0xff]  ;;  %222 = vst.msk [vmem:[#allocation2 + $0x50] sm:$0xff] %vm211_vm0, %v1131_v0 }
  0x34   : > { %v289_v45 = vpack.c.bf16 %v271_v41, %v269_v40  ;;  %v268_v48 = vld [vmem:[%s1218_s19 + $0xc0] sm:$0xff]  ;;  %v270_v49 = vld [vmem:[%s1218_s19 + $0xd0] sm:$0xff]  ;;  %v257_v50 = vld [vmem:[%s1218_s19 + $0x68] sm:$0xff]  ;;  %v280_v54 = vpack.c.bf16 %v254_v47, %v252_v46  ;;  %223 = vst.msk [vmem:[#allocation2 + $0x58] sm:$0xff] %vm211_vm0, %v1131_v0 }
  0x35   : > { %865 = vmatpush3.bf16.msra.mxu0 %v1007_v7  ;;  %933 = vmatpush3.bf16.msra.mxu1 %v1007_v7  ;;  %v259_v51 = vld [vmem:[%s1218_s19 + $0x78] sm:$0xff]  ;;  %v273_v52 = vld [vmem:[%s1218_s19 + $0xe8] sm:$0xff]  ;;  %v288_v55 = vpack.c.bf16 %v270_v49, %v268_v48  ;;  %v256_v58 = vld [vmem:[%s1218_s19 + $0x60] sm:$0xff]  ;;  %224 = vst.msk [vmem:[#allocation2 + $0x60] sm:$0xff] %vm211_vm0, %v1131_v0 }
  0x36   : > { %866 = vmatprep.subr.bf16.mxu0 %v1008_v8  ;;  %926 = vmatprep.subr.bf16.mxu1 %v1008_v8  ;;  %v275_v53 = vld [vmem:[%s1218_s19 + $0xf8] sm:$0xff]  ;;  %v283_v56 = vpack.c.bf16 %v259_v51, %v257_v50  ;;  %v258_v59 = vld [vmem:[%s1218_s19 + $0x70] sm:$0xff]  ;;  %v272_v60 = vld [vmem:[%s1218_s19 + $0xe0] sm:$0xff]  ;;  %225 = vst.msk [vmem:[#allocation2 + $0x68] sm:$0xff] %vm211_vm0, %v1131_v0 }
  0x37   : > { %v291_v57 = vpack.c.bf16 %v275_v53, %v273_v52  ;;  %v274_v61 = vld [vmem:[%s1218_s19 + $0xf0] sm:$0xff]  ;;  %v282_v62 = vpack.c.bf16 %v258_v59, %v256_v58  ;;  %226 = vst.msk [vmem:[#allocation2 + $0x70] sm:$0xff] %vm211_vm0, %v1131_v0  ;;  %227 = vst.msk [vmem:[#allocation2 + $0x78] sm:$0xff] %vm211_vm0, %v1131_v0  ;;  %v228_v4 = vld [vmem:[#allocation2] sm:$0xff]  ;;  %s836_s19 = sshll.u32 %s1118_s12, 4 }
  0x38   : > { %v290_v63 = vpack.c.bf16 %v274_v61, %v272_v60  ;;  %v236_v6 = vld [vmem:[#allocation2 + $0x40] sm:$0xff]  ;;  %v229_v14 = vld [vmem:[#allocation2 + $0x8] sm:$0xff]  ;;  %v230_v24 = vld [vmem:[#allocation2 + $0x10] sm:$0xff]  ;;  %p201_p7 = scmp.lt.s32.totalorder %s836_s19, 31 }
  0x39   : > { %867 = vmatpush3.bf16.msra.mxu0 %v1009_v9  ;;  %934 = vmatpush3.bf16.msra.mxu1 %v1009_v9  ;;  %v237_v16 = vld [vmem:[#allocation2 + $0x48] sm:$0xff]  ;;  %v231_v34 = vld [vmem:[#allocation2 + $0x18] sm:$0xff]  ;;  %v232_v47 = vld [vmem:[#allocation2 + $0x20] sm:$0xff] }
  0x3a   : > { %868 = vmatprep.subr.bf16.mxu0 %v1010_v10  ;;  %927 = vmatprep.subr.bf16.mxu1 %v1010_v10  ;;  %v238_v26 = vld [vmem:[#allocation2 + $0x50] sm:$0xff]  ;;  %v233_v61 = vld [vmem:[#allocation2 + $0x28] sm:$0xff]  ;;  %s1518_s19 = smov (!%p201_p7, %s836_s19), 31 }
  0x3b   : > { %v239_v36 = vld [vmem:[#allocation2 + $0x58] sm:$0xff]  ;;  %s837_s5 = sshll.u32 %s1518_s19, 3 }
  0x3c   : > { %v240_v49 = vld [vmem:[#allocation2 + $0x60] sm:$0xff]  ;;  %s1388_s12 = scalar_lea.vmem %s1506_s2, %s837_s5 }
  0x3d   : > { %869 = vmatpush3.bf16.msra.mxu0 %v1011_v17  ;;  %935 = vmatpush3.bf16.msra.mxu1 %v1011_v17 }
  0x3e   : > { %870 = vmatprep.subr.bf16.mxu0 %v1012_v18  ;;  %928 = vmatprep.subr.bf16.mxu1 %v1012_v18 }
  0x41   : > { %871 = vmatpush3.bf16.msra.mxu0 %v1013_v19  ;;  %936 = vmatpush3.bf16.msra.mxu1 %v1013_v19 }
  0x42   : > { %872 = vmatprep.subr.bf16.mxu0 %v1014_v20  ;;  %929 = vmatprep.subr.bf16.mxu1 %v1014_v20 }
  0x45   : > { %873 = vmatpush3.bf16.msra.mxu0 %v1015_v21  ;;  %937 = vmatpush3.bf16.msra.mxu1 %v1015_v21 }
  0x48   : > { %453 = vmatmul.mubr.bf16.vlgmr.msra.gmra.mxu0 %v276_v30  ;;  %485 = vmatmul.mubr.bf16.vlgmr.msra.gmra.mxu1 %v284_v31 }
  0x49   : > { %460 = vmatprep.mubr.bf16.mxu0 %v279_v32  ;;  %492 = vmatprep.mubr.bf16.mxu1 %v287_v33 }
  0x50   : > { %461 = vmatmul.mubr.bf16.gmra.mxu0 %v278_v42  ;;  %493 = vmatmul.mubr.bf16.gmra.mxu1 %v286_v43 }
  0x51   : > { %468 = vmatprep.mubr.bf16.mxu0 %v281_v44  ;;  %500 = vmatprep.mubr.bf16.mxu1 %v289_v45 }
  0x58   : > { %469 = vmatmul.mubr.bf16.gmra.mxu0 %v280_v54  ;;  %501 = vmatmul.mubr.bf16.gmra.mxu1 %v288_v55 }
  0x59   : > { %476 = vmatprep.mubr.bf16.mxu0 %v283_v56  ;;  %508 = vmatprep.mubr.bf16.mxu1 %v291_v57 }
  0x60   : > { %477 = vmatmul.mubr.bf16.gmra.mxu0 %v282_v62  ;;  %509 = vmatmul.mubr.bf16.gmra.mxu1 %v290_v63  ;;  %v241_v63 = vld [vmem:[#allocation2 + $0x68] sm:$0xff] }
 0x108   : > { %v874_v2 = vpop.f32.mrf.mxu0  ;;  %v898_v3 = vpop.f32.mrf.mxu1 }
 0x10a   : > { %v875_v5 = vpop.f32.mrf.mxu0  ;;  %v899_v7 = vpop.f32.mrf.mxu1 }
 0x10b   : > { %v876_v8 = vadd.f32 %v875_v5, %v874_v2  ;;  %v900_v9 = vadd.f32 %v899_v7, %v898_v3 }
 0x10c   : > { %v877_v10 = vpop.f32.mrf.mxu0  ;;  %v901_v11 = vpop.f32.mrf.mxu1 }
 0x10d   : > { %v517_v12 = vadd.f32 %v876_v8, %v228_v4  ;;  %v525_v13 = vadd.f32 %v900_v9, %v236_v6 }
 0x10e   : > { %v878_v15 = vpop.f32.mrf.mxu0  ;;  %v902_v17 = vpop.f32.mrf.mxu1 }
 0x10f   : > { %534 = vst.msk [vmem:[#allocation2] sm:$0xff] %vm211_vm0, %v517_v12  ;;  %542 = vst.msk [vmem:[#allocation2 + $0x40] sm:$0xff] %vm211_vm0, %v525_v13  ;;  %v879_v18 = vadd.f32 %v878_v15, %v877_v10  ;;  %v903_v19 = vadd.f32 %v902_v17, %v901_v11  ;;  %v234_v11 = vld [vmem:[#allocation2 + $0x30] sm:$0xff] }
 0x110   : > { %v880_v20 = vpop.f32.mrf.mxu0  ;;  %v904_v21 = vpop.f32.mrf.mxu1  ;;  %v242_v13 = vld [vmem:[#allocation2 + $0x70] sm:$0xff] }
 0x111   : > { %v518_v22 = vadd.f32 %v879_v18, %v229_v14  ;;  %v526_v23 = vadd.f32 %v903_v19, %v237_v16 }
 0x112   : > { %v881_v25 = vpop.f32.mrf.mxu0  ;;  %v905_v27 = vpop.f32.mrf.mxu1 }
 0x113   : > { %535 = vst.msk [vmem:[#allocation2 + $0x8] sm:$0xff] %vm211_vm0, %v518_v22  ;;  %543 = vst.msk [vmem:[#allocation2 + $0x48] sm:$0xff] %vm211_vm0, %v526_v23  ;;  %v882_v28 = vadd.f32 %v881_v25, %v880_v20  ;;  %v906_v29 = vadd.f32 %v905_v27, %v904_v21  ;;  %v235_v25 = vld [vmem:[#allocation2 + $0x38] sm:$0xff] }
 0x114   : > { %v883_v30 = vpop.f32.mrf.mxu0  ;;  %v907_v31 = vpop.f32.mrf.mxu1  ;;  %v243_v27 = vld [vmem:[#allocation2 + $0x78] sm:$0xff] }
 0x115   : > { %v519_v32 = vadd.f32 %v882_v28, %v230_v24  ;;  %v527_v33 = vadd.f32 %v906_v29, %v238_v26 }
 0x116   : > { %v884_v35 = vpop.f32.mrf.mxu0  ;;  %v908_v37 = vpop.f32.mrf.mxu1  ;;  %v1324_v38 = vld [vmem:[#allocation2] sm:$0xff] }
 0x117   : > { %536 = vst.msk [vmem:[#allocation2 + $0x10] sm:$0xff] %vm211_vm0, %v519_v32  ;;  %544 = vst.msk [vmem:[#allocation2 + $0x50] sm:$0xff] %vm211_vm0, %v527_v33  ;;  %v885_v39 = vadd.f32 %v884_v35, %v883_v30  ;;  %v909_v40 = vadd.f32 %v908_v37, %v907_v31  ;;  %v569_v41 = vmax.f32 %v1324_v38, 1.0  ;;  %v1329_v44 = vld [vmem:[#allocation2 + $0x40] sm:$0xff] }
 0x118   : > { %v886_v42 = vpop.f32.mrf.mxu0  ;;  %v910_v43 = vpop.f32.mrf.mxu1  ;;  %v577_v55 = vmax.f32 %v1329_v44, 1.0 }
 0x119   : > { %v520_v45 = vadd.f32 %v885_v39, %v231_v34  ;;  %v528_v46 = vadd.f32 %v909_v40, %v239_v36  ;;  %587 = vperm.xlu0 %998, %v569_v41  }
 0x11a   : > { %v887_v48 = vpop.f32.mrf.mxu0  ;;  %v911_v50 = vpop.f32.mrf.mxu1  ;;  %v1331_v51 = vld [vmem:[#allocation2 + $0x48] sm:$0xff] }
 0x11b   : > { %537 = vst.msk [vmem:[#allocation2 + $0x18] sm:$0xff] %vm211_vm0, %v520_v45  ;;  %545 = vst.msk [vmem:[#allocation2 + $0x58] sm:$0xff] %vm211_vm0, %v528_v46  ;;  %v888_v52 = vadd.f32 %v887_v48, %v886_v42  ;;  %v912_v53 = vadd.f32 %v911_v50, %v910_v43  ;;  %v578_v54 = vmax.f32 %v1331_v51, 1.0  ;;  %v1337_v58 = vld [vmem:[#allocation2 + $0x8] sm:$0xff] }
 0x11c   : > { %v889_v56 = vpop.f32.mrf.mxu0  ;;  %v913_v57 = vpop.f32.mrf.mxu1  ;;  %v570_v5 = vmax.f32 %v1337_v58, 1.0 }
 0x11d   : > { %v521_v59 = vadd.f32 %v888_v52, %v232_v47  ;;  %v529_v60 = vadd.f32 %v912_v53, %v240_v49  ;;  %632 = vperm.xlu1 %999, %v578_v54   ;;  %627 = vperm.xlu0 %998, %v577_v55  }
 0x11e   : > { %v890_v62 = vpop.f32.mrf.mxu0  ;;  %v914_v0 = vpop.f32.mrf.mxu1  ;;  %v1339_v1 = vld [vmem:[#allocation2 + $0x10] sm:$0xff] }
 0x11f   : > { %538 = vst.msk [vmem:[#allocation2 + $0x20] sm:$0xff] %vm211_vm0, %v521_v59  ;;  %546 = vst.msk [vmem:[#allocation2 + $0x60] sm:$0xff] %vm211_vm0, %v529_v60  ;;  %v891_v2 = vadd.f32 %v890_v62, %v889_v56  ;;  %v915_v3 = vadd.f32 %v914_v0, %v913_v57  ;;  %v571_v4 = vmax.f32 %v1339_v1, 1.0  ;;  %v1345_v8 = vld [vmem:[#allocation2 + $0x50] sm:$0xff] }
 0x120   : > { %v892_v6 = vpop.f32.mrf.mxu0  ;;  %v916_v7 = vpop.f32.mrf.mxu1  ;;  %v579_v19 = vmax.f32 %v1345_v8, 1.0 }
 0x121   : > { %v522_v9 = vadd.f32 %v891_v2, %v233_v61  ;;  %v530_v10 = vadd.f32 %v915_v3, %v241_v63  ;;  %597 = vperm.xlu1 %999, %v571_v4   ;;  %592 = vperm.xlu0 %998, %v570_v5   ;;  %v1133_v3 = vmov 1.0  }
 0x122   : > { %v893_v12 = vpop.f32.mrf.mxu0  ;;  %v917_v14 = vpop.f32.mrf.mxu1  ;;  %v1347_v15 = vld [vmem:[#allocation2 + $0x18] sm:$0xff] }
 0x123   : > { %539 = vst.msk [vmem:[#allocation2 + $0x28] sm:$0xff] %vm211_vm0, %v522_v9  ;;  %547 = vst.msk [vmem:[#allocation2 + $0x68] sm:$0xff] %vm211_vm0, %v530_v10  ;;  %v894_v16 = vadd.f32 %v893_v12, %v892_v6  ;;  %v918_v17 = vadd.f32 %v917_v14, %v916_v7  ;;  %v572_v18 = vmax.f32 %v1347_v15, 1.0  ;;  %v1353_v22 = vld [vmem:[#allocation2 + $0x58] sm:$0xff] }
 0x124   : > { %v895_v20 = vpop.f32.mrf.mxu0  ;;  %v919_v21 = vpop.f32.mrf.mxu1  ;;  %v580_v32 = vmax.f32 %v1353_v22, 1.0 }
 0x125   : > { %v523_v23 = vadd.f32 %v894_v16, %v234_v11  ;;  %v531_v24 = vadd.f32 %v918_v17, %v242_v13  ;;  %602 = vperm.xlu1 %999, %v572_v18   ;;  %637 = vperm.xlu0 %998, %v579_v19  }
 0x126   : > { %v896_v26 = vpop.f32.mrf.mxu0  ;;  %v920_v28 = vpop.f32.mrf.mxu1  ;;  %v1355_v29 = vld [vmem:[#allocation2 + $0x20] sm:$0xff] }
 0x127   : > { %540 = vst.msk [vmem:[#allocation2 + $0x30] sm:$0xff] %vm211_vm0, %v523_v23  ;;  %548 = vst.msk [vmem:[#allocation2 + $0x70] sm:$0xff] %vm211_vm0, %v531_v24  ;;  %v897_v30 = vadd.f32 %v896_v26, %v895_v20  ;;  %v921_v31 = vadd.f32 %v920_v28, %v919_v21  ;;  %v573_v33 = vmax.f32 %v1355_v29, 1.0  ;;  %v1361_v34 = vld [vmem:[#allocation2 + $0x60] sm:$0xff] }
 0x128   : > { %v581_v40 = vmax.f32 %v1361_v34, 1.0 }
 0x129   : > { %v524_v35 = vadd.f32 %v897_v30, %v235_v25  ;;  %v532_v36 = vadd.f32 %v921_v31, %v243_v27  ;;  %642 = vperm.xlu1 %999, %v580_v32   ;;  %607 = vperm.xlu0 %998, %v573_v33  }
 0x12a   : > { %v1363_v37 = vld [vmem:[#allocation2 + $0x28] sm:$0xff] }
 0x12b   : > { %541 = vst.msk [vmem:[#allocation2 + $0x38] sm:$0xff] %vm211_vm0, %v524_v35  ;;  %549 = vst.msk [vmem:[#allocation2 + $0x78] sm:$0xff] %vm211_vm0, %v532_v36  ;;  %v574_v39 = vmax.f32 %v1363_v37, 1.0  ;;  %v1369_v41 = vld [vmem:[#allocation2 + $0x68] sm:$0xff] }
 0x12c   : > { %v582_v43 = vmax.f32 %v1369_v41, 1.0 }
 0x12d   : > { %612 = vperm.xlu1 %999, %v574_v39   ;;  %647 = vperm.xlu0 %998, %v581_v40  }
 0x12e   : > { %v1371_v42 = vld [vmem:[#allocation2 + $0x30] sm:$0xff] }
 0x12f   : > { %v575_v45 = vmax.f32 %v1371_v42, 1.0  ;;  %v1375_v46 = vld [vmem:[#allocation2 + $0x70] sm:$0xff] }
 0x130   : > { %v583_v49 = vmax.f32 %v1375_v46, 1.0 }
 0x131   : > { %652 = vperm.xlu1 %999, %v582_v43   ;;  %617 = vperm.xlu0 %998, %v575_v45  }
 0x132   : > { %v1377_v47 = vld [vmem:[#allocation2 + $0x38] sm:$0xff] }
 0x133   : > { %v576_v48 = vmax.f32 %v1377_v47, 1.0  ;;  %v1381_v50 = vld [vmem:[#allocation2 + $0x78] sm:$0xff] }
 0x134   : > { %v584_v52 = vmax.f32 %v1381_v50, 1.0 }
 0x135   : > { %622 = vperm.xlu1 %999, %v576_v48   ;;  %657 = vperm.xlu0 %998, %v583_v49  }
 0x139   : > { %662 = vperm.xlu1 %999, %v584_v52  }
 0x194   : > { %v588_v53 = vpop.permute.xlu0 %587 }
 0x195   : > { %1016 = vrcp.f32 %v588_v53 }
 0x198   : > { %v633_v54 = vpop.permute.xlu1 %632  ;;  %v628_v55 = vpop.permute.xlu0 %627 }
 0x199   : > { %1018 = vrcp.f32 %v633_v54 }
 0x19a   : > { %1020 = vrcp.f32 %v628_v55 }
 0x19c   : > { %v598_v56 = vpop.permute.xlu1 %597  ;;  %v593_v57 = vpop.permute.xlu0 %592 }
 0x19d   : > { %1022 = vrcp.f32 %v598_v56 }
 0x19e   : > { %1024 = vrcp.f32 %v593_v57 }
 0x1a0   : > { %v603_v59 = vpop.permute.xlu1 %602  ;;  %v638_v60 = vpop.permute.xlu0 %637 }
 0x1a1   : > { %1026 = vrcp.f32 %v603_v59 }
 0x1a2   : > { %v1017_v61 = vpop.eup %1016  ;;  %1028 = vrcp.f32 %v638_v60 }
 0x1a3   : > { %v666_v62 = vmul.f32 %v1017_v61, %v1324_v38 }
 0x1a4   : > { %v643_v63 = vpop.permute.xlu1 %642  ;;  %v608_v0 = vpop.permute.xlu0 %607 }
 0x1a5   : > { %698 = vst.msk [vmem:[%s1388_s12] sm:$0xff] %vm697_vm1, %v666_v62  ;;  %1030 = vrcp.f32 %v643_v63 }
 0x1a6   : > { %v1019_v2 = vpop.eup %1018  ;;  %715 = vst.msk [vmem:[%s1388_s12] sm:$0xff] %vm714_vm2, %v1133_v3  ;;  %1032 = vrcp.f32 %v608_v0 }
 0x1a7   : > { %v1021_v4 = vpop.eup %1020  ;;  %v684_v5 = vmul.f32 %v1019_v2, %v1331_v51 }
 0x1a8   : > { %v682_v38 = vmul.f32 %v1021_v4, %v1329_v44  ;;  %v613_v6 = vpop.permute.xlu1 %612  ;;  %v648_v7 = vpop.permute.xlu0 %647 }
 0x1a9   : > { %707 = vst.msk [vmem:[%s1388_s12 + $0x48] sm:$0xff] %vm697_vm1, %v684_v5  ;;  %1034 = vrcp.f32 %v613_v6 }
 0x1aa   : > { %v1023_v9 = vpop.eup %1022  ;;  %724 = vst.msk [vmem:[%s1388_s12 + $0x48] sm:$0xff] %vm714_vm2, %v1133_v3  ;;  %1036 = vrcp.f32 %v648_v7 }
 0x1ab   : > { %706 = vst.msk [vmem:[%s1388_s12 + $0x40] sm:$0xff] %vm697_vm1, %v682_v38  ;;  %v1025_v10 = vpop.eup %1024  ;;  %v670_v44 = vmul.f32 %v1023_v9, %v1339_v1 }
 0x1ac   : > { %723 = vst.msk [vmem:[%s1388_s12 + $0x40] sm:$0xff] %vm714_vm2, %v1133_v3  ;;  %v668_v51 = vmul.f32 %v1025_v10, %v1337_v58  ;;  %v653_v11 = vpop.permute.xlu1 %652  ;;  %v618_v12 = vpop.permute.xlu0 %617 }
 0x1ad   : > { %700 = vst.msk [vmem:[%s1388_s12 + $0x10] sm:$0xff] %vm697_vm1, %v670_v44  ;;  %1038 = vrcp.f32 %v653_v11 }
 0x1ae   : > { %v1027_v13 = vpop.eup %1026  ;;  %717 = vst.msk [vmem:[%s1388_s12 + $0x10] sm:$0xff] %vm714_vm2, %v1133_v3  ;;  %1040 = vrcp.f32 %v618_v12 }
 0x1af   : > { %699 = vst.msk [vmem:[%s1388_s12 + $0x8] sm:$0xff] %vm697_vm1, %v668_v51  ;;  %v1029_v14 = vpop.eup %1028  ;;  %v672_v58 = vmul.f32 %v1027_v13, %v1347_v15 }
 0x1b0   : > { %716 = vst.msk [vmem:[%s1388_s12 + $0x8] sm:$0xff] %vm714_vm2, %v1133_v3  ;;  %v686_v1 = vmul.f32 %v1029_v14, %v1345_v8  ;;  %v623_v16 = vpop.permute.xlu1 %622  ;;  %v658_v17 = vpop.permute.xlu0 %657 }
 0x1b1   : > { %701 = vst.msk [vmem:[%s1388_s12 + $0x18] sm:$0xff] %vm697_vm1, %v672_v58  ;;  %1042 = vrcp.f32 %v623_v16 }
 0x1b2   : > { %v1031_v18 = vpop.eup %1030  ;;  %718 = vst.msk [vmem:[%s1388_s12 + $0x18] sm:$0xff] %vm714_vm2, %v1133_v3  ;;  %1044 = vrcp.f32 %v658_v17 }
 0x1b3   : > { %708 = vst.msk [vmem:[%s1388_s12 + $0x50] sm:$0xff] %vm697_vm1, %v686_v1  ;;  %v1033_v19 = vpop.eup %1032  ;;  %v688_v8 = vmul.f32 %v1031_v18, %v1353_v22 }
 0x1b4   : > { %725 = vst.msk [vmem:[%s1388_s12 + $0x50] sm:$0xff] %vm714_vm2, %v1133_v3  ;;  %v674_v15 = vmul.f32 %v1033_v19, %v1355_v29  ;;  %v663_v20 = vpop.permute.xlu1 %662 }
 0x1b5   : > { %709 = vst.msk [vmem:[%s1388_s12 + $0x58] sm:$0xff] %vm697_vm1, %v688_v8  ;;  %1046 = vrcp.f32 %v663_v20 }
 0x1b6   : > { %v1035_v21 = vpop.eup %1034  ;;  %726 = vst.msk [vmem:[%s1388_s12 + $0x58] sm:$0xff] %vm714_vm2, %v1133_v3 }
 0x1b7   : > { %702 = vst.msk [vmem:[%s1388_s12 + $0x20] sm:$0xff] %vm697_vm1, %v674_v15  ;;  %v1037_v23 = vpop.eup %1036  ;;  %v676_v22 = vmul.f32 %v1035_v21, %v1363_v37 }
 0x1b8   : > { %719 = vst.msk [vmem:[%s1388_s12 + $0x20] sm:$0xff] %vm714_vm2, %v1133_v3  ;;  %v690_v24 = vmul.f32 %v1037_v23, %v1361_v34 }
 0x1b9   : > { %703 = vst.msk [vmem:[%s1388_s12 + $0x28] sm:$0xff] %vm697_vm1, %v676_v22 }
 0x1ba   : > { %v1039_v25 = vpop.eup %1038  ;;  %720 = vst.msk [vmem:[%s1388_s12 + $0x28] sm:$0xff] %vm714_vm2, %v1133_v3 }
 0x1bb   : > { %710 = vst.msk [vmem:[%s1388_s12 + $0x60] sm:$0xff] %vm697_vm1, %v690_v24  ;;  %v1041_v26 = vpop.eup %1040  ;;  %v692_v27 = vmul.f32 %v1039_v25, %v1369_v41 }
 0x1bc   : > { %727 = vst.msk [vmem:[%s1388_s12 + $0x60] sm:$0xff] %vm714_vm2, %v1133_v3  ;;  %v678_v28 = vmul.f32 %v1041_v26, %v1371_v42 }
 0x1bd   : > { %711 = vst.msk [vmem:[%s1388_s12 + $0x68] sm:$0xff] %vm697_vm1, %v692_v27 }
 0x1be   : > { %v1043_v29 = vpop.eup %1042  ;;  %728 = vst.msk [vmem:[%s1388_s12 + $0x68] sm:$0xff] %vm714_vm2, %v1133_v3 }
 0x1bf   : > { %704 = vst.msk [vmem:[%s1388_s12 + $0x30] sm:$0xff] %vm697_vm1, %v678_v28  ;;  %v1045_v30 = vpop.eup %1044  ;;  %v680_v31 = vmul.f32 %v1043_v29, %v1377_v47 }
 0x1c0   : > { %721 = vst.msk [vmem:[%s1388_s12 + $0x30] sm:$0xff] %vm714_vm2, %v1133_v3  ;;  %v694_v32 = vmul.f32 %v1045_v30, %v1375_v46 }
 0x1c1   : > { %705 = vst.msk [vmem:[%s1388_s12 + $0x38] sm:$0xff] %vm697_vm1, %v680_v31 }
 0x1c2   : > { %v1047_v33 = vpop.eup %1046  ;;  %722 = vst.msk [vmem:[%s1388_s12 + $0x38] sm:$0xff] %vm714_vm2, %v1133_v3 }
 0x1c3   : > { %712 = vst.msk [vmem:[%s1388_s12 + $0x70] sm:$0xff] %vm697_vm1, %v694_v32  ;;  %v696_v34 = vmul.f32 %v1047_v33, %v1381_v50 }
 0x1c4   : > { %729 = vst.msk [vmem:[%s1388_s12 + $0x70] sm:$0xff] %vm714_vm2, %v1133_v3 }
 0x1c5   : > { %713 = vst.msk [vmem:[%s1388_s12 + $0x78] sm:$0xff] %vm697_vm1, %v696_v34 }
 0x1c6   : > { %730 = vst.msk [vmem:[%s1388_s12 + $0x78] sm:$0xff] %vm714_vm2, %v1133_v3 }
 0x1c7 PF: > { %s15_s14 = sadd.s32 1, %s1126_s14   ;;  %s1510_s9 = smov %s1110_s10 }
 0x1c8   : > { %p12_p8 = scmp.ge.s32.totalorder %s15_s14, 4   ;;  %s1511_s10 = smov %s1114_s11 }
 0x1c9   : > { %s1512_s11 = smov %s1198_s21  ;;  %s1513_s12 = smov %s1122_s13 }
 0x1ca   : > { %s1514_s13 = smov %s1516_s16  ;;  %14 = sbr.rel (!%p12_p8) target bundleno = 4 (0x4), region = 79 }
 0x1cf   :  { %753 = vsyncpa [#allocation4], 1 }
 0x1d0   :  { %755 = vsyncpa [#allocation4 + $0x1], 1 }

</bundles_post_ra>
